<compile_context>
chip_gen: v6e
topology: v6e:2x2x1
jax: 0.10.0
libtpu: 0.0.40
codegen_flags: <defaults>
</compile_context>

<pallas_src>
import math

import jax
import jax.numpy as jnp
from jax.experimental import pallas as pl
from jax.experimental.pallas import tpu as pltpu


def build_pe_table(d_model: int, max_len: int = 5000) -> jnp.ndarray:
    """Deterministic buffer init mirroring PositionalEncoding.__init__."""
    assert d_model % 2 == 0, "PositionalEncoding requires an even d_model (sin/cos interleave)."
    position = jnp.arange(max_len, dtype=jnp.float32)[:, None]                 # (max_len, 1)
    div_term = jnp.exp(
        jnp.arange(0, d_model, 2, dtype=jnp.float32) * (-math.log(10000.0) / d_model)
    )                                                                           # (d_model//2,)
    pe = jnp.zeros((max_len, d_model), dtype=jnp.float32)
    pe = pe.at[:, 0::2].set(jnp.sin(position * div_term))
    pe = pe.at[:, 1::2].set(jnp.cos(position * div_term))
    return pe


def _pe_gather_kernel(idx_ref, pe_ref, out_ref):
    # idx_ref: SMEM scalar-prefetched flat indices (int32)
    # pe_ref:  full (max_len, d_model) table, VMEM-resident across grid steps
    # out_ref: (tm, d_model) output tile for this grid step
    tm = out_ref.shape[0]
    base = pl.program_id(0) * tm
    # Statically unrolled row gather: store offsets are static/tile-aligned, only
    # the table-row load index is dynamic.  The copies are independent, so the
    # scheduler packs ld/st slots and the loop hides under the tile's HBM
    # writeback DMA for this memory-bound op.
    for r in range(tm):
        out_ref[r, :] = pe_ref[idx_ref[base + r], :]


def positional_encoding_lookup(x_idx: jnp.ndarray, pe: jnp.ndarray, tm: int = 256) -> jnp.ndarray:
    """Pallas TPU gather: returns pe[x_idx] with shape x_idx.shape + (d_model,)."""
    max_len, d_model = pe.shape
    orig_shape = x_idx.shape
    flat = x_idx.reshape(-1).astype(jnp.int32)
    n = int(flat.shape[0])

    # Row tile: multiple of 8 sublanes, large enough to amortize per-grid-step
    # overhead, clamped so tiny inputs do not over-pad.
    n8 = ((n + 7) // 8) * 8
    tm = max(8, min(((tm + 7) // 8) * 8, n8))
    n_pad = ((n + tm - 1) // tm) * tm
    if n_pad != n:
        # Padded rows gather row 0 (always in range) and are sliced off below.
        flat = jnp.pad(flat, (0, n_pad - n))

    grid = (n_pad // tm,)

    table_bytes = max_len * d_model * 4
    out_tile_bytes = tm * d_model * 4
    # The table's index_map is constant but the default pipeline still
    # double-buffers it; budget VMEM explicitly so large tables don't trip the
    # ~32 MiB default scoped limit (v6e/v7x).
    needed = 2 * table_bytes + 2 * out_tile_bytes + 4 * n_pad + (1 << 20)
    vmem_limit = int(min(max(needed, 32 * 1024 * 1024), 100 * 1024 * 1024))

    cost = pl.CostEstimate(
        flops=0,
        transcendentals=0,
        bytes_accessed=n_pad * d_model * 4 + table_bytes + n_pad * 4,
    )

    out = pl.pallas_call(
        _pe_gather_kernel,
        out_shape=jax.ShapeDtypeStruct((n_pad, d_model), pe.dtype),
        grid_spec=pltpu.PrefetchScalarGridSpec(
            num_scalar_prefetch=1,                     # flat indices -> SMEM
            grid=grid,
            in_specs=[
                # Whole PE table kept resident in VMEM across all grid steps.
                pl.BlockSpec((max_len, d_model), lambda i, idx: (0, 0)),
            ],
            out_specs=pl.BlockSpec((tm, d_model), lambda i, idx: (i, 0)),
        ),
        compiler_params=pltpu.CompilerParams(
            # Each output tile is independent -> shardable across v7x's two
            # TensorCores; harmless on single-TC v5e/v6e.
            dimension_semantics=("parallel",),
            vmem_limit_bytes=vmem_limit,
        ),
        cost_estimate=cost,
    )(flat, pe)

    if n_pad != n:
        out = out[:n]
    return out.reshape(*orig_shape, d_model)


if __name__ == "__main__":
    key = jax.random.PRNGKey(0)

    # Case A: small demo shapes (batch=2, seq=8, d_model=32, max_len=64).
    d_model, max_len = 32, 64
    pe = build_pe_table(d_model, max_len)
    xA = jax.random.randint(key, (2, 8), 0, max_len, dtype=jnp.int32)
    outA = jax.block_until_ready(positional_encoding_lookup(xA, pe))
    refA = pe[xA]
    assert outA.shape == (2, 8, d_model), outA.shape
    assert outA.dtype == jnp.float32, outA.dtype
    assert jnp.array_equal(outA, refA), "case A mismatch vs reference gather"

    # Case B: large-tile path (tm=256, grid=2, lane-dense d_model=128).
    d_model_b, max_len_b = 128, 512
    pe_b = build_pe_table(d_model_b, max_len_b)
    xB = jax.random.randint(jax.random.fold_in(key, 1), (4, 128), 0, max_len_b, dtype=jnp.int32)
    outB = jax.block_until_ready(positional_encoding_lookup(xB, pe_b))
    assert jnp.array_equal(outB, pe_b[xB]), "case B mismatch vs reference gather"

    # Case C: row count not a multiple of the tile (exercises pad + slice tail).
    xC = jax.random.randint(jax.random.fold_in(key, 2), (3, 100), 0, max_len_b, dtype=jnp.int32)
    outC = jax.block_until_ready(positional_encoding_lookup(xC, pe_b))
    assert jnp.array_equal(outC, pe_b[xC]), "case C mismatch vs reference gather"

    print("KERNEL_OK")
</pallas_src>

<mosaic_0001>
module attributes {stable_mosaic.version = 11 : i64} {
  func.func @_pe_gather_kernel(%arg0: i32, %arg1: memref<16xi32, #tpu.memory_space<smem>>, %arg2: memref<64x32xf32, #tpu.memory_space<vmem>>, %arg3: memref<16x32xf32, #tpu.memory_space<vmem>>) attributes {dimension_semantics = [#tpu.dimension_semantics<parallel>], iteration_bounds = array<i64: 1>, scalar_prefetch = 1 : i64, scratch_operands = 0 : i64, tpu.core_type = #tpu.core_type<tc>, window_params = [{pipeline_mode = #tpu.pipeline_mode<synchronous>, transform_indices = @transform_0, window_bounds = array<i64: 64, 32>}, {transform_indices = @transform_1, window_bounds = array<i64: 16, 32>}]} {
    %c16_i32 = arith.constant 16 : i32
    %0 = arith.muli %arg0, %c16_i32 : i32
    %c0_i32 = arith.constant 0 : i32
    %1 = arith.addi %0, %c0_i32 : i32
    %2 = arith.index_cast %1 : i32 to index
    %3 = memref.load %arg1[%2] : memref<16xi32, #tpu.memory_space<smem>>
    %4 = arith.index_cast %3 : i32 to index
    %c0 = arith.constant 0 : index
    %5 = vector.load %arg2[%4, %c0] : memref<64x32xf32, #tpu.memory_space<vmem>>, vector<1x32xf32>
    %6 = vector.shape_cast %5 : vector<1x32xf32> to vector<32xf32>
    %c0_0 = arith.constant 0 : index
    %c0_1 = arith.constant 0 : index
    %7 = vector.load %arg3[%c0_0, %c0_1] : memref<16x32xf32, #tpu.memory_space<vmem>>, vector<1x32xf32>
    %8 = vector.shape_cast %7 : vector<1x32xf32> to vector<32xf32>
    %9 = vector.shape_cast %6 : vector<32xf32> to vector<1x32xf32>
    tpu.vector_store %arg3[%c0_0, %c0_1], %9 {strides = array<i32>} : memref<16x32xf32, #tpu.memory_space<vmem>>, vector<1x32xf32>,
    %c1_i32 = arith.constant 1 : i32
    %10 = arith.addi %0, %c1_i32 : i32
    %11 = arith.index_cast %10 : i32 to index
    %12 = memref.load %arg1[%11] : memref<16xi32, #tpu.memory_space<smem>>
    %13 = arith.index_cast %12 : i32 to index
    %c0_2 = arith.constant 0 : index
    %14 = vector.load %arg2[%13, %c0_2] : memref<64x32xf32, #tpu.memory_space<vmem>>, vector<1x32xf32>
    %15 = vector.shape_cast %14 : vector<1x32xf32> to vector<32xf32>
    %c1 = arith.constant 1 : index
    %c0_3 = arith.constant 0 : index
    %16 = vector.load %arg3[%c1, %c0_3] : memref<16x32xf32, #tpu.memory_space<vmem>>, vector<1x32xf32>
    %17 = vector.shape_cast %16 : vector<1x32xf32> to vector<32xf32>
    %18 = vector.shape_cast %15 : vector<32xf32> to vector<1x32xf32>
    tpu.vector_store %arg3[%c1, %c0_3], %18 {strides = array<i32>} : memref<16x32xf32, #tpu.memory_space<vmem>>, vector<1x32xf32>,
    %c2_i32 = arith.constant 2 : i32
    %19 = arith.addi %0, %c2_i32 : i32
    %20 = arith.index_cast %19 : i32 to index
    %21 = memref.load %arg1[%20] : memref<16xi32, #tpu.memory_space<smem>>
    %22 = arith.index_cast %21 : i32 to index
    %c0_4 = arith.constant 0 : index
    %23 = vector.load %arg2[%22, %c0_4] : memref<64x32xf32, #tpu.memory_space<vmem>>, vector<1x32xf32>
    %24 = vector.shape_cast %23 : vector<1x32xf32> to vector<32xf32>
    %c2 = arith.constant 2 : index
    %c0_5 = arith.constant 0 : index
    %25 = vector.load %arg3[%c2, %c0_5] : memref<16x32xf32, #tpu.memory_space<vmem>>, vector<1x32xf32>
    %26 = vector.shape_cast %25 : vector<1x32xf32> to vector<32xf32>
    %27 = vector.shape_cast %24 : vector<32xf32> to vector<1x32xf32>
    tpu.vector_store %arg3[%c2, %c0_5], %27 {strides = array<i32>} : memref<16x32xf32, #tpu.memory_space<vmem>>, vector<1x32xf32>,
    %c3_i32 = arith.constant 3 : i32
    %28 = arith.addi %0, %c3_i32 : i32
    %29 = arith.index_cast %28 : i32 to index
    %30 = memref.load %arg1[%29] : memref<16xi32, #tpu.memory_space<smem>>
    %31 = arith.index_cast %30 : i32 to index
    %c0_6 = arith.constant 0 : index
    %32 = vector.load %arg2[%31, %c0_6] : memref<64x32xf32, #tpu.memory_space<vmem>>, vector<1x32xf32>
    %33 = vector.shape_cast %32 : vector<1x32xf32> to vector<32xf32>
    %c3 = arith.constant 3 : index
    %c0_7 = arith.constant 0 : index
    %34 = vector.load %arg3[%c3, %c0_7] : memref<16x32xf32, #tpu.memory_space<vmem>>, vector<1x32xf32>
    %35 = vector.shape_cast %34 : vector<1x32xf32> to vector<32xf32>
    %36 = vector.shape_cast %33 : vector<32xf32> to vector<1x32xf32>
    tpu.vector_store %arg3[%c3, %c0_7], %36 {strides = array<i32>} : memref<16x32xf32, #tpu.memory_space<vmem>>, vector<1x32xf32>,
    %c4_i32 = arith.constant 4 : i32
    %37 = arith.addi %0, %c4_i32 : i32
    %38 = arith.index_cast %37 : i32 to index
    %39 = memref.load %arg1[%38] : memref<16xi32, #tpu.memory_space<smem>>
    %40 = arith.index_cast %39 : i32 to index
    %c0_8 = arith.constant 0 : index
    %41 = vector.load %arg2[%40, %c0_8] : memref<64x32xf32, #tpu.memory_space<vmem>>, vector<1x32xf32>
    %42 = vector.shape_cast %41 : vector<1x32xf32> to vector<32xf32>
    %c4 = arith.constant 4 : index
    %c0_9 = arith.constant 0 : index
    %43 = vector.load %arg3[%c4, %c0_9] : memref<16x32xf32, #tpu.memory_space<vmem>>, vector<1x32xf32>
    %44 = vector.shape_cast %43 : vector<1x32xf32> to vector<32xf32>
    %45 = vector.shape_cast %42 : vector<32xf32> to vector<1x32xf32>
    tpu.vector_store %arg3[%c4, %c0_9], %45 {strides = array<i32>} : memref<16x32xf32, #tpu.memory_space<vmem>>, vector<1x32xf32>,
    %c5_i32 = arith.constant 5 : i32
    %46 = arith.addi %0, %c5_i32 : i32
    %47 = arith.index_cast %46 : i32 to index
    %48 = memref.load %arg1[%47] : memref<16xi32, #tpu.memory_space<smem>>
    %49 = arith.index_cast %48 : i32 to index
    %c0_10 = arith.constant 0 : index
    %50 = vector.load %arg2[%49, %c0_10] : memref<64x32xf32, #tpu.memory_space<vmem>>, vector<1x32xf32>
    %51 = vector.shape_cast %50 : vector<1x32xf32> to vector<32xf32>
    %c5 = arith.constant 5 : index
    %c0_11 = arith.constant 0 : index
    %52 = vector.load %arg3[%c5, %c0_11] : memref<16x32xf32, #tpu.memory_space<vmem>>, vector<1x32xf32>
    %53 = vector.shape_cast %52 : vector<1x32xf32> to vector<32xf32>
    %54 = vector.shape_cast %51 : vector<32xf32> to vector<1x32xf32>
    tpu.vector_store %arg3[%c5, %c0_11], %54 {strides = array<i32>} : memref<16x32xf32, #tpu.memory_space<vmem>>, vector<1x32xf32>,
    %c6_i32 = arith.constant 6 : i32
    %55 = arith.addi %0, %c6_i32 : i32
    %56 = arith.index_cast %55 : i32 to index
    %57 = memref.load %arg1[%56] : memref<16xi32, #tpu.memory_space<smem>>
    %58 = arith.index_cast %57 : i32 to index
    %c0_12 = arith.constant 0 : index
    %59 = vector.load %arg2[%58, %c0_12] : memref<64x32xf32, #tpu.memory_space<vmem>>, vector<1x32xf32>
    %60 = vector.shape_cast %59 : vector<1x32xf32> to vector<32xf32>
    %c6 = arith.constant 6 : index
    %c0_13 = arith.constant 0 : index
    %61 = vector.load %arg3[%c6, %c0_13] : memref<16x32xf32, #tpu.memory_space<vmem>>, vector<1x32xf32>
    %62 = vector.shape_cast %61 : vector<1x32xf32> to vector<32xf32>
    %63 = vector.shape_cast %60 : vector<32xf32> to vector<1x32xf32>
    tpu.vector_store %arg3[%c6, %c0_13], %63 {strides = array<i32>} : memref<16x32xf32, #tpu.memory_space<vmem>>, vector<1x32xf32>,
    %c7_i32 = arith.constant 7 : i32
    %64 = arith.addi %0, %c7_i32 : i32
    %65 = arith.index_cast %64 : i32 to index
    %66 = memref.load %arg1[%65] : memref<16xi32, #tpu.memory_space<smem>>
    %67 = arith.index_cast %66 : i32 to index
    %c0_14 = arith.constant 0 : index
    %68 = vector.load %arg2[%67, %c0_14] : memref<64x32xf32, #tpu.memory_space<vmem>>, vector<1x32xf32>
    %69 = vector.shape_cast %68 : vector<1x32xf32> to vector<32xf32>
    %c7 = arith.constant 7 : index
    %c0_15 = arith.constant 0 : index
    %70 = vector.load %arg3[%c7, %c0_15] : memref<16x32xf32, #tpu.memory_space<vmem>>, vector<1x32xf32>
    %71 = vector.shape_cast %70 : vector<1x32xf32> to vector<32xf32>
    %72 = vector.shape_cast %69 : vector<32xf32> to vector<1x32xf32>
    tpu.vector_store %arg3[%c7, %c0_15], %72 {strides = array<i32>} : memref<16x32xf32, #tpu.memory_space<vmem>>, vector<1x32xf32>,
    %c8_i32 = arith.constant 8 : i32
    %73 = arith.addi %0, %c8_i32 : i32
    %74 = arith.index_cast %73 : i32 to index
    %75 = memref.load %arg1[%74] : memref<16xi32, #tpu.memory_space<smem>>
    %76 = arith.index_cast %75 : i32 to index
    %c0_16 = arith.constant 0 : index
    %77 = vector.load %arg2[%76, %c0_16] : memref<64x32xf32, #tpu.memory_space<vmem>>, vector<1x32xf32>
    %78 = vector.shape_cast %77 : vector<1x32xf32> to vector<32xf32>
    %c8 = arith.constant 8 : index
    %c0_17 = arith.constant 0 : index
    %79 = vector.load %arg3[%c8, %c0_17] : memref<16x32xf32, #tpu.memory_space<vmem>>, vector<1x32xf32>
    %80 = vector.shape_cast %79 : vector<1x32xf32> to vector<32xf32>
    %81 = vector.shape_cast %78 : vector<32xf32> to vector<1x32xf32>
    tpu.vector_store %arg3[%c8, %c0_17], %81 {strides = array<i32>} : memref<16x32xf32, #tpu.memory_space<vmem>>, vector<1x32xf32>,
    %c9_i32 = arith.constant 9 : i32
    %82 = arith.addi %0, %c9_i32 : i32
    %83 = arith.index_cast %82 : i32 to index
    %84 = memref.load %arg1[%83] : memref<16xi32, #tpu.memory_space<smem>>
    %85 = arith.index_cast %84 : i32 to index
    %c0_18 = arith.constant 0 : index
    %86 = vector.load %arg2[%85, %c0_18] : memref<64x32xf32, #tpu.memory_space<vmem>>, vector<1x32xf32>
    %87 = vector.shape_cast %86 : vector<1x32xf32> to vector<32xf32>
    %c9 = arith.constant 9 : index
    %c0_19 = arith.constant 0 : index
    %88 = vector.load %arg3[%c9, %c0_19] : memref<16x32xf32, #tpu.memory_space<vmem>>, vector<1x32xf32>
    %89 = vector.shape_cast %88 : vector<1x32xf32> to vector<32xf32>
    %90 = vector.shape_cast %87 : vector<32xf32> to vector<1x32xf32>
    tpu.vector_store %arg3[%c9, %c0_19], %90 {strides = array<i32>} : memref<16x32xf32, #tpu.memory_space<vmem>>, vector<1x32xf32>,
    %c10_i32 = arith.constant 10 : i32
    %91 = arith.addi %0, %c10_i32 : i32
    %92 = arith.index_cast %91 : i32 to index
    %93 = memref.load %arg1[%92] : memref<16xi32, #tpu.memory_space<smem>>
    %94 = arith.index_cast %93 : i32 to index
    %c0_20 = arith.constant 0 : index
    %95 = vector.load %arg2[%94, %c0_20] : memref<64x32xf32, #tpu.memory_space<vmem>>, vector<1x32xf32>
    %96 = vector.shape_cast %95 : vector<1x32xf32> to vector<32xf32>
    %c10 = arith.constant 10 : index
    %c0_21 = arith.constant 0 : index
    %97 = vector.load %arg3[%c10, %c0_21] : memref<16x32xf32, #tpu.memory_space<vmem>>, vector<1x32xf32>
    %98 = vector.shape_cast %97 : vector<1x32xf32> to vector<32xf32>
    %99 = vector.shape_cast %96 : vector<32xf32> to vector<1x32xf32>
    tpu.vector_store %arg3[%c10, %c0_21], %99 {strides = array<i32>} : memref<16x32xf32, #tpu.memory_space<vmem>>, vector<1x32xf32>,
    %c11_i32 = arith.constant 11 : i32
    %100 = arith.addi %0, %c11_i32 : i32
    %101 = arith.index_cast %100 : i32 to index
    %102 = memref.load %arg1[%101] : memref<16xi32, #tpu.memory_space<smem>>
    %103 = arith.index_cast %102 : i32 to index
    %c0_22 = arith.constant 0 : index
    %104 = vector.load %arg2[%103, %c0_22] : memref<64x32xf32, #tpu.memory_space<vmem>>, vector<1x32xf32>
    %105 = vector.shape_cast %104 : vector<1x32xf32> to vector<32xf32>
    %c11 = arith.constant 11 : index
    %c0_23 = arith.constant 0 : index
    %106 = vector.load %arg3[%c11, %c0_23] : memref<16x32xf32, #tpu.memory_space<vmem>>, vector<1x32xf32>
    %107 = vector.shape_cast %106 : vector<1x32xf32> to vector<32xf32>
    %108 = vector.shape_cast %105 : vector<32xf32> to vector<1x32xf32>
    tpu.vector_store %arg3[%c11, %c0_23], %108 {strides = array<i32>} : memref<16x32xf32, #tpu.memory_space<vmem>>, vector<1x32xf32>,
    %c12_i32 = arith.constant 12 : i32
    %109 = arith.addi %0, %c12_i32 : i32
    %110 = arith.index_cast %109 : i32 to index
    %111 = memref.load %arg1[%110] : memref<16xi32, #tpu.memory_space<smem>>
    %112 = arith.index_cast %111 : i32 to index
    %c0_24 = arith.constant 0 : index
    %113 = vector.load %arg2[%112, %c0_24] : memref<64x32xf32, #tpu.memory_space<vmem>>, vector<1x32xf32>
    %114 = vector.shape_cast %113 : vector<1x32xf32> to vector<32xf32>
    %c12 = arith.constant 12 : index
    %c0_25 = arith.constant 0 : index
    %115 = vector.load %arg3[%c12, %c0_25] : memref<16x32xf32, #tpu.memory_space<vmem>>, vector<1x32xf32>
    %116 = vector.shape_cast %115 : vector<1x32xf32> to vector<32xf32>
    %117 = vector.shape_cast %114 : vector<32xf32> to vector<1x32xf32>
    tpu.vector_store %arg3[%c12, %c0_25], %117 {strides = array<i32>} : memref<16x32xf32, #tpu.memory_space<vmem>>, vector<1x32xf32>,
    %c13_i32 = arith.constant 13 : i32
    %118 = arith.addi %0, %c13_i32 : i32
    %119 = arith.index_cast %118 : i32 to index
    %120 = memref.load %arg1[%119] : memref<16xi32, #tpu.memory_space<smem>>
    %121 = arith.index_cast %120 : i32 to index
    %c0_26 = arith.constant 0 : index
    %122 = vector.load %arg2[%121, %c0_26] : memref<64x32xf32, #tpu.memory_space<vmem>>, vector<1x32xf32>
    %123 = vector.shape_cast %122 : vector<1x32xf32> to vector<32xf32>
    %c13 = arith.constant 13 : index
    %c0_27 = arith.constant 0 : index
    %124 = vector.load %arg3[%c13, %c0_27] : memref<16x32xf32, #tpu.memory_space<vmem>>, vector<1x32xf32>
    %125 = vector.shape_cast %124 : vector<1x32xf32> to vector<32xf32>
    %126 = vector.shape_cast %123 : vector<32xf32> to vector<1x32xf32>
    tpu.vector_store %arg3[%c13, %c0_27], %126 {strides = array<i32>} : memref<16x32xf32, #tpu.memory_space<vmem>>, vector<1x32xf32>,
    %c14_i32 = arith.constant 14 : i32
    %127 = arith.addi %0, %c14_i32 : i32
    %128 = arith.index_cast %127 : i32 to index
    %129 = memref.load %arg1[%128] : memref<16xi32, #tpu.memory_space<smem>>
    %130 = arith.index_cast %129 : i32 to index
    %c0_28 = arith.constant 0 : index
    %131 = vector.load %arg2[%130, %c0_28] : memref<64x32xf32, #tpu.memory_space<vmem>>, vector<1x32xf32>
    %132 = vector.shape_cast %131 : vector<1x32xf32> to vector<32xf32>
    %c14 = arith.constant 14 : index
    %c0_29 = arith.constant 0 : index
    %133 = vector.load %arg3[%c14, %c0_29] : memref<16x32xf32, #tpu.memory_space<vmem>>, vector<1x32xf32>
    %134 = vector.shape_cast %133 : vector<1x32xf32> to vector<32xf32>
    %135 = vector.shape_cast %132 : vector<32xf32> to vector<1x32xf32>
    tpu.vector_store %arg3[%c14, %c0_29], %135 {strides = array<i32>} : memref<16x32xf32, #tpu.memory_space<vmem>>, vector<1x32xf32>,
    %c15_i32 = arith.constant 15 : i32
    %136 = arith.addi %0, %c15_i32 : i32
    %137 = arith.index_cast %136 : i32 to index
    %138 = memref.load %arg1[%137] : memref<16xi32, #tpu.memory_space<smem>>
    %139 = arith.index_cast %138 : i32 to index
    %c0_30 = arith.constant 0 : index
    %140 = vector.load %arg2[%139, %c0_30] : memref<64x32xf32, #tpu.memory_space<vmem>>, vector<1x32xf32>
    %141 = vector.shape_cast %140 : vector<1x32xf32> to vector<32xf32>
    %c15 = arith.constant 15 : index
    %c0_31 = arith.constant 0 : index
    %142 = vector.load %arg3[%c15, %c0_31] : memref<16x32xf32, #tpu.memory_space<vmem>>, vector<1x32xf32>
    %143 = vector.shape_cast %142 : vector<1x32xf32> to vector<32xf32>
    %144 = vector.shape_cast %141 : vector<32xf32> to vector<1x32xf32>
    tpu.vector_store %arg3[%c15, %c0_31], %144 {strides = array<i32>} : memref<16x32xf32, #tpu.memory_space<vmem>>, vector<1x32xf32>,
    return
  }
  func.func @transform_0(%arg0: i32, %arg1: memref<16xi32, #tpu.memory_space<smem>>) -> (i32, i32) {
    %c0_i32 = arith.constant 0 : i32
    %c0_i32_0 = arith.constant 0 : i32
    %c0_i32_1 = arith.constant 0 : i32
    return %c0_i32, %c0_i32_0 : i32, i32
  }
  func.func @transform_1(%arg0: i32, %arg1: memref<16xi32, #tpu.memory_space<smem>>) -> (i32, i32) {
    %c0_i32 = arith.constant 0 : i32
    %c0_i32_0 = arith.constant 0 : i32
    return %arg0, %c0_i32 : i32, i32
  }
}

</mosaic_0001>

<bundles_post_ra>
// kernel: tpu_custom_call.1
= control target key start
LH: loop header
LB: loop body
LE: loop exit
PB: predicated region body
PF: predicated region fallthrough
CT: control target
= control target key end

     0   :  { %s273_s0 = inlined_call_operand.vmem [shape: s32[16], index: 0, kind: input, shape index: {}]   ;;  %s274_s1 = inlined_call_operand.vmem [shape: f32[64,32], index: 1, kind: input, shape index: {}]   ;;  %s275_s2 = inlined_call_operand.hbm [shape: f32[16,32], index: 2, kind: output, shape index: {}]  }
   0x1   :  { %s7_s11 = sshll.u32 %s273_s0, 4  ;;  %s8_s11 = int_to_ptr.vmem [resolvable:$true] %s7_s11 }
   0x2   :  { %s148_s12 = scalar_lea.vmem %s8_s11, 16  ;;  %p153_p1 = scmp.lt.s32.totalorder %s8_s11, %s8_s11 }
   0x3   :  { %p149_p0 = scmp.ne.s32.totalorder %s8_s11, %s148_s12  ;;  %p154_p2 = scmp.lt.s32.totalorder %s148_s12, %s148_s12 }
   0x5   :  { %p155_p3 = por %p154_p2, %p153_p1 }
   0x7   :  { %p156_p4 = pnand %p155_p3, %p149_p0 }
   0x9   :  { %159 = shalt.err (!%p156_p4)  }
   0xa   :  { %s184_s13 = smov [#allocation3]  }
   0xb   :  { %10 = dma.vmem_to_smem %s8_s11, 16, %s184_s13, [#allocation2] }
   0xc   :  { %180 = dma.done.wait [#allocation2], 16 }
   0xd   :  { %181 = vsyncadd [#allocation2], 4294967280 }
   0xe   :  { %12 = sfence }
   0xf   :  { %s17_s14 = sld [smem:[#allocation3]] }
  0x10   :  { %13 = vsyncpa [#allocation5], 0  ;;  %s129_s15 = sld [smem:[#allocation3 + $0x1]]  ;;  %vm20_vm0 = vcmask 253952   ;;  %s185_s7 = smov [#allocation4]  }
  0x11   :  { %s130_s16 = sld [smem:[#allocation3 + $0x2]]  ;;  %s102_s8 = sshll.u32 %s185_s7, 4  ;;  %s103_s8 = int_to_ptr.vmem [resolvable:$true] %s102_s8 }
  0x12   :  { %s131_s17 = sld [smem:[#allocation3 + $0x3]]  ;;  %p165_p6 = scmp.lt.s32.totalorder %s103_s8, %s103_s8 }
  0x13   :  { %s132_s18 = sld [smem:[#allocation3 + $0x4]] }
  0x14   :  { %s133_s0 = sld [smem:[#allocation3 + $0x5]] }
  0x15   :  { %s18_s21 = scalar_lea.vmem %s274_s1, %s17_s14  ;;  %s134_s22 = sld [smem:[#allocation3 + $0x6]] }
  0x16   :  { %v19_v0 = vld [vmem:[%s18_s21] sm:$0x1]  ;;  %s24_s25 = scalar_lea.vmem %s274_s1, %s129_s15  ;;  %s135_s26 = sld [smem:[#allocation3 + $0x7]] }
  0x17   :  { %21 = vst.msk [vmem:[#allocation4] sm:$0x1] %vm20_vm0, %v19_v0  ;;  %v25_v1 = vld [vmem:[%s24_s25] sm:$0x1]  ;;  %s29_s29 = scalar_lea.vmem %s274_s1, %s130_s16  ;;  %s136_s30 = sld [smem:[#allocation3 + $0x8]] }
  0x18   :  { %26 = vst.msk [vmem:[#allocation4 + $0x1] sm:$0x1] %vm20_vm0, %v25_v1  ;;  %v30_v2 = vld [vmem:[%s29_s29] sm:$0x1]  ;;  %s34_s5 = scalar_lea.vmem %s274_s1, %s131_s17  ;;  %s137_s6 = sld [smem:[#allocation3 + $0x9]] }
  0x19   :  { %31 = vst.msk [vmem:[#allocation4 + $0x2] sm:$0x1] %vm20_vm0, %v30_v2  ;;  %v35_v3 = vld [vmem:[%s34_s5] sm:$0x1]  ;;  %s39_s9 = scalar_lea.vmem %s274_s1, %s132_s18  ;;  %s138_s10 = sld [smem:[#allocation3 + $0xa]] }
  0x1a   :  { %36 = vst.msk [vmem:[#allocation4 + $0x3] sm:$0x1] %vm20_vm0, %v35_v3  ;;  %v40_v4 = vld [vmem:[%s39_s9] sm:$0x1]  ;;  %s44_s13 = scalar_lea.vmem %s274_s1, %s133_s0  ;;  %s139_s14 = sld [smem:[#allocation3 + $0xb]] }
  0x1b   :  { %41 = vst.msk [vmem:[#allocation4 + $0x4] sm:$0x1] %vm20_vm0, %v40_v4  ;;  %v45_v5 = vld [vmem:[%s44_s13] sm:$0x1]  ;;  %s49_s17 = scalar_lea.vmem %s274_s1, %s134_s22  ;;  %s140_s19 = sld [smem:[#allocation3 + $0xc]] }
  0x1c   :  { %46 = vst.msk [vmem:[#allocation4 + $0x5] sm:$0x1] %vm20_vm0, %v45_v5  ;;  %v50_v6 = vld [vmem:[%s49_s17] sm:$0x1]  ;;  %s54_s21 = scalar_lea.vmem %s274_s1, %s135_s26  ;;  %s141_s23 = sld [smem:[#allocation3 + $0xd]] }
  0x1d   :  { %51 = vst.msk [vmem:[#allocation4 + $0x6] sm:$0x1] %vm20_vm0, %v50_v6  ;;  %v55_v7 = vld [vmem:[%s54_s21] sm:$0x1]  ;;  %s59_s25 = scalar_lea.vmem %s274_s1, %s136_s30  ;;  %s142_s27 = sld [smem:[#allocation3 + $0xe]] }
  0x1e   :  { %56 = vst.msk [vmem:[#allocation4 + $0x7] sm:$0x1] %vm20_vm0, %v55_v7  ;;  %v60_v8 = vld [vmem:[%s59_s25] sm:$0x1]  ;;  %s64_s29 = scalar_lea.vmem %s274_s1, %s137_s6  ;;  %s143_s3 = sld [smem:[#allocation3 + $0xf]] }
  0x1f   :  { %61 = vst.msk [vmem:[#allocation4 + $0x8] sm:$0x1] %vm20_vm0, %v60_v8  ;;  %v65_v9 = vld [vmem:[%s64_s29] sm:$0x1]  ;;  %s69_s5 = scalar_lea.vmem %s274_s1, %s138_s10 }
  0x20   :  { %66 = vst.msk [vmem:[#allocation4 + $0x9] sm:$0x1] %vm20_vm0, %v65_v9  ;;  %v70_v10 = vld [vmem:[%s69_s5] sm:$0x1]  ;;  %s74_s11 = scalar_lea.vmem %s274_s1, %s139_s14 }
  0x21   :  { %71 = vst.msk [vmem:[#allocation4 + $0xa] sm:$0x1] %vm20_vm0, %v70_v10  ;;  %v75_v11 = vld [vmem:[%s74_s11] sm:$0x1]  ;;  %s79_s13 = scalar_lea.vmem %s274_s1, %s140_s19 }
  0x22   :  { %76 = vst.msk [vmem:[#allocation4 + $0xb] sm:$0x1] %vm20_vm0, %v75_v11  ;;  %v80_v12 = vld [vmem:[%s79_s13] sm:$0x1]  ;;  %s84_s16 = scalar_lea.vmem %s274_s1, %s141_s23  ;;  %s160_s23 = scalar_lea.vmem %s103_s8, 256 }
  0x23   :  { %81 = vst.msk [vmem:[#allocation4 + $0xc] sm:$0x1] %vm20_vm0, %v80_v12  ;;  %v85_v13 = vld [vmem:[%s84_s16] sm:$0x1]  ;;  %s89_s18 = scalar_lea.vmem %s274_s1, %s142_s27  ;;  %p161_p5 = scmp.ne.s32.totalorder %s103_s8, %s160_s23 }
  0x24   :  { %86 = vst.msk [vmem:[#allocation4 + $0xd] sm:$0x1] %vm20_vm0, %v85_v13  ;;  %v90_v14 = vld [vmem:[%s89_s18] sm:$0x1]  ;;  %s94_s21 = scalar_lea.vmem %s274_s1, %s143_s3  ;;  %p166_p7 = scmp.lt.s32.totalorder %s160_s23, %s160_s23 }
  0x25   :  { %91 = vst.msk [vmem:[#allocation4 + $0xe] sm:$0x1] %vm20_vm0, %v90_v14  ;;  %v95_v15 = vld [vmem:[%s94_s21] sm:$0x1] }
  0x26   :  { %96 = vst.msk [vmem:[#allocation4 + $0xf] sm:$0x1] %vm20_vm0, %v95_v15  ;;  %p167_p8 = por %p166_p7, %p165_p6 }
  0x28   :  { %p168_p9 = pnand %p167_p8, %p161_p5 }
  0x2a   :  { %171 = shalt.err (!%p168_p9)
}
  0x2b   :  { %s186_s0 = smov 128   ;;  %s187_s24 = smov 8  }
  0x2c   :  { %108 = dma.vmem_to_hbm [thread:$0]  %s103_s8, 256, %s275_s2, [#allocation5], %s186_s0, %s186_s0, %s187_s24  }
  0x2d   :  { %182 = dma.done.wait [#allocation5], 256  }
  0x2e   :  { %183 = vsyncadd [#allocation5], 4294967040 }
  0x2f   :  { %112 = vsyncpa [#allocation5], 1 }

</bundles_post_ra>
